<compile_context>
chip_gen: v7x
topology: tpu7x:2x2x1
jax: 0.10.0
libtpu: 0.0.40
codegen_flags: <defaults>
</compile_context>

<pallas_src>
import functools
import math

import jax
import jax.numpy as jnp
from jax import lax
from jax.experimental import pallas as pl
from jax.experimental.pallas import tpu as pltpu

LANES = 128  # padded RHS width: [features | ones/order column | zero pad]


def _hop_kernel(a_ref, r1_ref, out_ref, acc_ref, *, d, tm, tk):
    """Pass 1: out row tile = [A@X - X | order(=A@1) | 0]."""
    i = pl.program_id(0)
    k = pl.program_id(1)

    @pl.when(k == 0)
    def _():
        acc_ref[...] = jnp.zeros_like(acc_ref)

    k0 = pl.multiple_of(k * tk, tk)
    rhs = r1_ref[pl.ds(k0, tk), :].astype(jnp.bfloat16)        # [X | 1 | 0]
    acc_ref[...] += jnp.dot(a_ref[...], rhs,
                            preferred_element_type=jnp.float32)

    @pl.when(k == pl.num_programs(1) - 1)
    def _():
        i0 = pl.multiple_of(i * tm, tm)
        r1_row = r1_ref[pl.ds(i0, tm), :]                      # [X | 1 | 0]
        lane = lax.broadcasted_iota(jnp.int32, (tm, LANES), 1)
        x_row = jnp.where(lane < d, r1_row, 0.0)               # [X | 0 | 0]
        out_ref[...] = acc_ref[...] - x_row                    # [AX-X|order|0]


def _score_kernel(a_ref, r1_ref, r2_ref, noise_ref, out_ref, acc_ref,
                  *, d, tm, tk):
    """Pass 2: accumulate A@[fst|order|0]; epilogue -> log(sigmoid)+Gumbel."""
    i = pl.program_id(0)
    k = pl.program_id(1)

    @pl.when(k == 0)
    def _():
        acc_ref[...] = jnp.zeros_like(acc_ref)

    k0 = pl.multiple_of(k * tk, tk)
    rhs = r2_ref[pl.ds(k0, tk), :].astype(jnp.bfloat16)        # [fst | order | 0]
    acc_ref[...] += jnp.dot(a_ref[...], rhs,
                            preferred_element_type=jnp.float32)

    @pl.when(k == pl.num_programs(1) - 1)
    def _():
        i0 = pl.multiple_of(i * tm, tm)
        z2 = acc_ref[...]                                      # [A@fst | A@order | 0]
        r1_row = r1_ref[pl.ds(i0, tm), :]                      # [X | 1 | 0]
        r2_row = r2_ref[pl.ds(i0, tm), :]                      # [fst | order | 0]
        lane = lax.broadcasted_iota(jnp.int32, (tm, LANES), 1)
        featm = lane < d
        ordm = lane == d

        x_row = jnp.where(featm, r1_row, 0.0)
        afst = jnp.where(featm, z2, 0.0)
        order = jnp.sum(jnp.where(ordm, r2_row, 0.0), axis=-1, keepdims=True)
        aord = jnp.sum(jnp.where(ordm, z2, 0.0), axis=-1, keepdims=True)

        # fst + scd == A@fst - order*X ;  fstNum + scdNum + eps == A@order - order + eps
        num = afst - order * x_row
        denom = aord - order + 1e-8
        sub = num * pl.reciprocal(denom, approx=True)

        inv_sub = lax.rsqrt(jnp.sum(sub * sub, axis=-1, keepdims=True) + 1e-24)
        inv_x = lax.rsqrt(jnp.sum(x_row * x_row, axis=-1, keepdims=True) + 1e-24)
        z = jnp.sum(sub * x_row, axis=-1, keepdims=True) * inv_sub * inv_x

        # log(sigmoid(z)) without underflow:  min(z,0) - log(1 + exp(-|z|))
        logsig = jnp.minimum(z, 0.0) - jnp.log(1.0 + jnp.exp(-jnp.abs(z)))

        u = jnp.clip(noise_ref[...], 1e-6, 1.0 - 1e-6)
        gumbel = -jnp.log(-jnp.log(u))

        # lane-dense (unmasked) store; wrapper slices column 0.
        out_ref[...] = jnp.broadcast_to(logsig + gumbel, (tm, LANES))


def local_graph_forward(all_one_adj_dense, embeds, noise_uniform,
                        central_nodes, *, tm=512, tk=512):
    """Returns (scores, seeds) matching LocalGraph.forward semantics.

    tm/tk default to 512 (near HBM roofline on v5e/v6e/v7x); pass smaller
    tiles for tiny graphs.
    """
    n, d = embeds.shape
    assert d <= LANES - 1, "feature dim must leave one lane for the degree col"

    tile = math.lcm(tm, tk)
    n_pad = -(-n // tile) * tile

    # TODO(synk): torch.spmm uses a sparse COO adjacency; Pallas has no sparse
    # matmul primitive, so A is densified to 0/1 and streamed as bf16 tiles.
    # TODO(synk): per-generation dtype (int8 on v5e/v6e, fp8-e4m3 on v7x) would
    # halve A traffic again; bf16 kept here for portability.
    a_p = jnp.zeros((n_pad, n_pad), jnp.bfloat16)
    a_p = a_p.at[:n, :n].set(all_one_adj_dense.astype(jnp.bfloat16))

    # Augmented, 128-lane RHS: [X | ones | zero pad]  (kept VMEM-resident).
    r1 = jnp.zeros((n_pad, LANES), jnp.float32)
    r1 = r1.at[:n, :d].set(embeds.astype(jnp.float32))
    r1 = r1.at[:, d].set(1.0)

    noise_p = jnp.full((n_pad, 1), 0.5, jnp.float32)
    noise_p = noise_p.at[:n, :].set(noise_uniform.astype(jnp.float32))

    grid = (n_pad // tm, n_pad // tk)
    cp = pltpu.CompilerParams(
        dimension_semantics=("parallel", "arbitrary"),
        vmem_limit_bytes=32 * 1024 * 1024,
    )

    a_spec = pl.BlockSpec((tm, tk), lambda i, k: (i, k))
    resident = pl.BlockSpec((n_pad, LANES), lambda i, k: (0, 0))  # DMA'd once
    row_out = pl.BlockSpec((tm, LANES), lambda i, k: (i, 0))
    noise_spec = pl.BlockSpec((tm, 1), lambda i, k: (i, 0))

    # Pass 1: R2 = [fst | order | 0]
    r2 = pl.pallas_call(
        functools.partial(_hop_kernel, d=d, tm=tm, tk=tk),
        out_shape=jax.ShapeDtypeStruct((n_pad, LANES), jnp.float32),
        grid_spec=pltpu.PrefetchScalarGridSpec(
            num_scalar_prefetch=0,
            grid=grid,
            in_specs=[a_spec, resident],
            out_specs=row_out,
            scratch_shapes=[pltpu.VMEM((tm, LANES), jnp.float32)],
        ),
        compiler_params=cp,
    )(a_p, r1)

    # Pass 2: scores (lane-dense (n_pad, 128), column 0 holds the value).
    scores_wide = pl.pallas_call(
        functools.partial(_score_kernel, d=d, tm=tm, tk=tk),
        out_shape=jax.ShapeDtypeStruct((n_pad, LANES), jnp.float32),
        grid_spec=pltpu.PrefetchScalarGridSpec(
            num_scalar_prefetch=0,
            grid=grid,
            in_specs=[a_spec, resident, resident, noise_spec],
            out_specs=row_out,
            scratch_shapes=[pltpu.VMEM((tm, LANES), jnp.float32)],
        ),
        compiler_params=cp,
    )(a_p, r1, r2, noise_p)

    scores = scores_wide[:n, 0]
    # top-k seed selection kept as JAX glue (no dense Pallas win here).
    _, seeds = jax.lax.top_k(scores, central_nodes)
    return scores, seeds


def _reference_scores(adj, x, u):
    """Pure-JAX f32 mirror of the PyTorch LocalGraph math (for validation)."""
    order = jnp.sum(adj, axis=-1, keepdims=True)
    fst = adj @ x - x
    scd = adj @ fst - fst - order * x
    scd_num = adj @ order - order - order
    sub = (fst + scd) / (order + scd_num + 1e-8)
    sub = sub / jnp.maximum(jnp.linalg.norm(sub, axis=-1, keepdims=True), 1e-12)
    xn = x / jnp.maximum(jnp.linalg.norm(x, axis=-1, keepdims=True), 1e-12)
    s = jax.nn.sigmoid(jnp.sum(sub * xn, axis=-1))
    return jnp.log(s) + (-jnp.log(-jnp.log(u[:, 0])))


if __name__ == "__main__":
    N, D = 256, 32           # nodes, embedding dim
    CENTRAL_NODES = 8        # stand-in for args.centralNodes

    key = jax.random.PRNGKey(0)
    k_adj, k_emb, k_noise = jax.random.split(key, 3)

    adj = (jax.random.uniform(k_adj, (N, N)) < 0.1).astype(jnp.float32)
    adj = jnp.maximum(adj, adj.T)                    # symmetric "all-one" adj
    adj = adj * (1.0 - jnp.eye(N, dtype=jnp.float32))

    embeds = jax.random.normal(k_emb, (N, D), dtype=jnp.float32) * 0.1 + 0.5

    # Uniform noise for the Gumbel perturbation (deterministic stand-in for
    # t.rand(...).cuda()); kept strictly inside (0, 1).
    noise = jax.random.uniform(
        k_noise, (N, 1), dtype=jnp.float32, minval=1e-6, maxval=1.0 - 1e-6)

    # Small tiles for the toy graph; real graphs should use the 512 defaults.
    scores, seeds = local_graph_forward(adj, embeds, noise, CENTRAL_NODES,
                                        tm=128, tk=128)
    jax.block_until_ready((scores, seeds))

    assert scores.shape == (N,)
    assert seeds.shape == (CENTRAL_NODES,)
    assert bool(jnp.all(jnp.isfinite(scores)))

    ref = _reference_scores(adj, embeds, noise)
    assert bool(jnp.max(jnp.abs(scores - ref)) < 2e-2), "mismatch vs reference"

    print("KERNEL_OK")
</pallas_src>

<mosaic_0001>
module attributes {stable_mosaic.version = 11 : i64} {
  func.func @_hop_kernel(%arg0: i32, %arg1: i32, %arg2: memref<128x128xbf16, #tpu.memory_space<vmem>>, %arg3: memref<256x128xf32, #tpu.memory_space<vmem>>, %arg4: memref<128x128xf32, #tpu.memory_space<vmem>>, %arg5: memref<128x128xf32, #tpu.memory_space<vmem>>) attributes {dimension_semantics = [#tpu.dimension_semantics<parallel>, #tpu.dimension_semantics<arbitrary>], iteration_bounds = array<i64: 2, 2>, scalar_prefetch = 0 : i64, scratch_operands = 1 : i64, tpu.core_type = #tpu.core_type<tc>, window_params = [{transform_indices = @transform_0, window_bounds = array<i64: 128, 128>}, {pipeline_mode = #tpu.pipeline_mode<synchronous>, transform_indices = @transform_1, window_bounds = array<i64: 256, 128>}, {transform_indices = @transform_2, window_bounds = array<i64: 128, 128>}]} {
    %c0_i32 = arith.constant 0 : i32
    %0 = arith.cmpi eq, %arg1, %c0_i32 : i32
    %1 = arith.extui %0 : i1 to i32
    %c0_i32_0 = arith.constant 0 : i32
    %2 = arith.cmpi ne, %1, %c0_i32_0 : i32
    scf.if %2 {
      %cst_8 = arith.constant 0.000000e+00 : f32
      %16 = vector.broadcast %cst_8 : f32 to vector<128x128xf32>
      %c0_9 = arith.constant 0 : index
      %c0_10 = arith.constant 0 : index
      %17 = vector.load %arg5[%c0_9, %c0_10] : memref<128x128xf32, #tpu.memory_space<vmem>>, vector<128x128xf32>
      tpu.vector_store %arg5[%c0_9, %c0_10], %16 {strides = array<i32>} : memref<128x128xf32, #tpu.memory_space<vmem>>, vector<128x128xf32>,
    } else {
    }
    %c128_i32 = arith.constant 128 : i32
    %3 = arith.muli %arg1, %c128_i32 : i32
    %4 = tpu.assume_multiple %3, 128 : i32
    %5 = arith.index_cast %4 : i32 to index
    %c0 = arith.constant 0 : index
    %6 = vector.load %arg3[%5, %c0] : memref<256x128xf32, #tpu.memory_space<vmem>>, vector<128x128xf32>
    %7 = arith.truncf %6 : vector<128x128xf32> to vector<128x128xbf16>
    %c0_1 = arith.constant 0 : index
    %c0_2 = arith.constant 0 : index
    %8 = vector.load %arg5[%c0_1, %c0_2] : memref<128x128xf32, #tpu.memory_space<vmem>>, vector<128x128xf32>
    %c0_3 = arith.constant 0 : index
    %c0_4 = arith.constant 0 : index
    %9 = vector.load %arg2[%c0_3, %c0_4] : memref<128x128xbf16, #tpu.memory_space<vmem>>, vector<128x128xbf16>
    %cst = arith.constant dense<0.000000e+00> : vector<128x128xf32>
    %10 = tpu.matmul %9, %7, %cst {dimension_numbers = #tpu.dot_dimension_numbers<[1], [0], [0], [1], [0, 0, 1, 1], [], []>} : vector<128x128xbf16>, vector<128x128xbf16>, vector<128x128xf32> -> vector<128x128xf32>
    %11 = arith.addf %8, %10 : vector<128x128xf32>
    %c0_5 = arith.constant 0 : index
    %c0_6 = arith.constant 0 : index
    %12 = vector.load %arg5[%c0_5, %c0_6] : memref<128x128xf32, #tpu.memory_space<vmem>>, vector<128x128xf32>
    tpu.vector_store %arg5[%c0_5, %c0_6], %11 {strides = array<i32>} : memref<128x128xf32, #tpu.memory_space<vmem>>, vector<128x128xf32>,
    %c1_i32 = arith.constant 1 : i32
    %13 = arith.cmpi eq, %arg1, %c1_i32 : i32
    %14 = arith.extui %13 : i1 to i32
    %c0_i32_7 = arith.constant 0 : i32
    %15 = arith.cmpi ne, %14, %c0_i32_7 : i32
    scf.if %15 {
      %c128_i32_8 = arith.constant 128 : i32
      %16 = arith.muli %arg0, %c128_i32_8 : i32
      %17 = tpu.assume_multiple %16, 128 : i32
      %18 = arith.index_cast %17 : i32 to index
      %c0_9 = arith.constant 0 : index
      %19 = vector.load %arg3[%18, %c0_9] : memref<256x128xf32, #tpu.memory_space<vmem>>, vector<128x128xf32>
      %20 = tpu.iota {dimensions = array<i32: 1>} : vector<128x128xi32>
      %c32_i32 = arith.constant 32 : i32
      %21 = vector.broadcast %c32_i32 : i32 to vector<128x128xi32>
      %22 = arith.cmpi slt, %20, %21 : vector<128x128xi32>
      %cst_10 = arith.constant 0.000000e+00 : f32
      %23 = vector.broadcast %cst_10 : f32 to vector<128x128xf32>
      %24 = arith.select %22, %19, %23 : vector<128x128xi1>, vector<128x128xf32>
      %c0_11 = arith.constant 0 : index
      %c0_12 = arith.constant 0 : index
      %25 = vector.load %arg5[%c0_11, %c0_12] : memref<128x128xf32, #tpu.memory_space<vmem>>, vector<128x128xf32>
      %26 = arith.subf %25, %24 : vector<128x128xf32>
      %c0_13 = arith.constant 0 : index
      %c0_14 = arith.constant 0 : index
      %27 = vector.load %arg4[%c0_13, %c0_14] : memref<128x128xf32, #tpu.memory_space<vmem>>, vector<128x128xf32>
      tpu.vector_store %arg4[%c0_13, %c0_14], %26 {strides = array<i32>} : memref<128x128xf32, #tpu.memory_space<vmem>>, vector<128x128xf32>,
    } else {
    }
    return
  }
  func.func @transform_0(%arg0: i32, %arg1: i32) -> (i32, i32) {
    %c0_i32 = arith.constant 0 : i32
    return %arg0, %arg1 : i32, i32
  }
  func.func @transform_1(%arg0: i32, %arg1: i32) -> (i32, i32) {
    %c0_i32 = arith.constant 0 : i32
    %c0_i32_0 = arith.constant 0 : i32
    %c0_i32_1 = arith.constant 0 : i32
    return %c0_i32, %c0_i32_0 : i32, i32
  }
  func.func @transform_2(%arg0: i32, %arg1: i32) -> (i32, i32) {
    %c0_i32 = arith.constant 0 : i32
    %c0_i32_0 = arith.constant 0 : i32
    return %arg0, %c0_i32 : i32, i32
  }
}

</mosaic_0001>

<bundles_post_ra>
// kernel: tpu_custom_call.1
= control target key start
LH: loop header
LB: loop body
LE: loop exit
PB: predicated region body
PF: predicated region fallthrough
CT: control target
= control target key end

     0   :  { %s1464_s0 = inlined_call_operand.hbm [shape: bf16[256,256], index: 0, kind: input, shape index: {}]   ;;  %s1465_s1 = inlined_call_operand.hbm [shape: f32[256,128], index: 1, kind: input, shape index: {}]   ;;  %s1466_s2 = inlined_call_operand.hbm [shape: f32[256,128], index: 2, kind: output, shape index: {}]  }
   0x1   :  { %1478 = sst [smem:[#allocation16_spill]] %s1465_s1 }
   0x2   :  { %7 = vsyncpa [#allocation4], 0 }
   0x3   :  { %9 = vsyncpa [#allocation4 + $0x1], 0 }
   0x4   :  { %10 = vsyncpa [#allocation7], 0 }
   0x5   :  { %11 = vsyncpa [#allocation5], 0 }
   0x6   :  { %13 = vsyncpa [#allocation5 + $0x1], 0  ;;  %s1089_s9 = smov 0   ;;  %s1091_s10 = smov 0  }
   0x7   :  { %s1093_s11 = smov 0   ;;  %s1095_s12 = smov 0  }
   0x8   :  { %s1097_s13 = smov 0   ;;  %s1099_s14 = smov 0  }
   0x9   :  { %s1101_s15 = smov 0   ;;  %s1103_s16 = smov 0  }
   0xa   :  { %s1105_s17 = smov 0   ;;  %s1107_s18 = smov 0  }
   0xb   :  { %s1109_s19 = smov 0  }
   0xc LB: > { %1479 = sst [smem:[#allocation12_spill]] %s1054_s17  ;;  %s654_s20 = sadd.s32 4294967295, %s1062_s19   ;;  %s1062_s19 = sphi %s1109_s19, %s19_s19   ;;  %s1058_s18 = sphi %s1107_s18, %s1512_s18   ;;  %s1054_s17 = sphi %s1105_s17, %s1503_s17   ;;  %s1050_s16 = sphi %s1103_s16, %s1511_s16   ;;  %s1046_s15 = sphi %s1101_s15, %s1502_s15   ;;  %s1042_s14 = sphi %s1099_s14, %s1510_s14   ;;  %s1038_s13 = sphi %s1097_s13, %s1509_s13   ;;  %s1034_s12 = sphi %s1095_s12, %s1508_s12   ;;  %s1030_s11 = sphi %s1093_s11, %s1507_s11   ;;  %s1026_s10 = sphi %s1091_s10, %s1506_s10   ;;  %s1022_s9 = sphi %s1089_s9, %s1505_s9  }
   0xd   : > { %s655_s21 = sadd.s32 4294967294, %s1062_s19   ;;  %p47_p0 = scmp.ne.s32.totalorder %s1042_s14, %s1038_s13 }
   0xe   : > { %p48_p1 = scmp.eq.s32.totalorder %s1062_s19, 0  ;;  %p53_p2 = scmp.ne.s32.totalorder %s1038_s13, %s1034_s12 }
   0xf   : > { %p1149_p3 = scmp.eq.s32.totalorder %s654_s20, 0  ;;  %p97_p5 = scmp.ne.s32.totalorder %s1030_s11, %s1026_s10 }
  0x10   : > { %p1154_p4 = por %p48_p1, %p47_p0  ;;  %p98_p7 = scmp.eq.s32.totalorder %s654_s20, 3 }
  0x11   : > { %s1480_s23 = scalar_select %p1149_p3, 1, 0 }
  0x12   : > { %p1162_p6 = por %p1149_p3, %p53_p2  ;;  %p103_p8 = scmp.ne.s32.totalorder %s1026_s10, %s1022_s9 }
  0x13   : > { %p104_p9 = scmp.eq.s32.totalorder %s655_s21, 3  ;;  %p1168_p10 = por %p98_p7, %p97_p5 }
  0x14   : > { %s1482_s26 = scalar_select %p1162_p6, 1, 0 }
  0x15   : > { %s1483_s27 = scalar_select %p1168_p10, 1, 0 }
  0x16   : > { %p656_p11 = scmp.ge.s32.totalorder %s1062_s19, 1  ;;  %p1173_p12 = por %p104_p9, %p103_p8 }
  0x17   : > { %p111_p13 = scmp.lt.s32.totalorder %s1062_s19, 5  ;;  %s1064_s30 = smov [#allocation6]  }
  0x18   : > { %s1484_s28 = scalar_select %p1173_p12, 1, 0 }
  0x19   : > { %p1178_p0 = pnand %p656_p11, %p111_p13  ;;  %s123_s3 = sshll.u32 %s1064_s30, 4  ;;  %s124_s3 = int_to_ptr.vmem [resolvable:$true] %s123_s3 }
  0x1a   : > { %1485 = sst [smem:[#allocation13_spill]] %s1484_s28  ;;  %p771_p2 = scmp.lt.s32.totalorder %s1062_s19, 4 }
  0x1b   : > { %s1486_s29 = scalar_select %p1178_p0, 1, 0 }
  0x1c   : > { %p758_p1 = pneg %p1178_p0  ;;  %p1193_p7 = pnand %p771_p2, %p1154_p4 }
  0x1d   : > { %s1489_s1 = sld [smem:[#allocation16_spill]] }
  0x1e   : > { %p1187_p5 = pnand %p758_p1, %p1149_p3 }
  0x1f   : > { %s1488_s5 = scalar_select %p1193_p7, 1, 0 }
  0x20   : > { %p880_p9 = pneg %p1187_p5 }
  0x23   : > { %s878_s8 = scalar_lea.hbm %s1489_s1, 4096 }
  0x24   : > { %p879_p8 = scmp.ne.s32.totalorder %s1489_s1, %s878_s8  ;;  %p885_p1 = scmp.lt.u32.totalorder %s878_s8, %s1489_s1 }
  0x26   : > { %p881_p11 = pnand %p880_p9, %p879_p8 }
  0x28   : > { %p882_p13 = pneg %p881_p11 }
  0x2a   : > { %p887_p4 = pnand %p885_p1, %p882_p13 }
  0x2c   : > { %890 = shalt.err (!%p887_p4)
}
  0x2d   : > { %s891_s25 = scalar_lea.vmem %s124_s3, 4096  ;;  %p899_p3 = scmp.lt.s32.totalorder %s124_s3, %s124_s3 }
  0x2e   : > { %p892_p2 = scmp.ne.s32.totalorder %s124_s3, %s891_s25  ;;  %p900_p6 = scmp.lt.s32.totalorder %s891_s25, %s891_s25 }
  0x30   : > { %p894_p12 = pnand %p892_p2, %p880_p9  ;;  %p901_p0 = por %p900_p6, %p899_p3 }
  0x32   : > { %p895_p10 = pneg %p894_p12 }
  0x34   : > { %p902_p7 = pnand %p901_p0, %p895_p10 }
  0x36   : > { %905 = shalt.err (!%p902_p7)
}
  0x37   : > { %s1473_s6 = smov 128   ;;  %s1066_s7 = smov 8  }
  0x38   : > { %761 = dma.hbm_to_vmem [thread:$0]  (!%p1187_p5), %s1489_s1, 4096, %s124_s3, [#allocation7], %s1473_s6, %s1473_s6, %s1066_s7  }
  0x39   : > { %s28_s20 = sadd.s32 1, %s1054_s17  ;;  %s31_s21 = sadd.s32 1, %s1058_s18 }
  0x3a   : > { %p29_p3 = scmp.ge.s32.totalorder %s28_s20, 2  ;;  %s137_s30 = sand.u32 1, %s1042_s14  }
  0x3b   : > { %s659_s25 = sshll.u32 %s137_s30, 6  ;;  %s684_s22 = sshll.u32 %s1058_s18, 5 }
  0x3c   : > { %s1514_s20 = smov (%p29_p3, %s28_s20), 0  ;;  %s1516_s21 = smov (!%p29_p3, %s31_s21), %s1058_s18 }
  0x3d   : > { %1490 = sst [smem:[#allocation14_spill]] %s1514_s20  ;;  %s36_s4 = ssub.s32 %s1054_s17, %s1514_s20 }
  0x3e   : > { %p33_p6 = scmp.ge.s32.totalorder %s1516_s21, 2  ;;  %s147_s24 = sadd.s32 %s1054_s17, %s684_s22 }
  0x3f   : > { %s141_s3 = scalar_lea.vmem [#allocation3], %s659_s25  ;;  %s662_s8 = sshll.u32 %s147_s24, 6 }
  0x40   : > { %s150_s7 = sshll.u32 %s141_s3, 4  ;;  %s1518_s21 = smov (%p33_p6, %s1516_s21), 0  ;;  %s1227_s7 = int_to_ptr.vmem [resolvable:$true] %s150_s7 }
  0x41   : > { %1491 = sst [smem:[#allocation15_spill]] %s1518_s21  ;;  %s35_s12 = ssub.s32 %s1058_s18, %s1518_s21 }
  0x42   : > { %s1234_s28 = scalar_lea.hbm %s1464_s0, %s662_s8  ;;  %s37_s22 = sor.u32 %s36_s4, %s35_s12 }
  0x43   : > { %p85_p10 = scmp.eq.s32.totalorder %s35_s12, 0  ;;  %p38_p12 = scmp.eq.s32.totalorder %s37_s22, 0 }
  0x44   : > { %s1492_s25 = sadd.s32 1, %s1030_s11  ;;  %s1493_s20 = sadd.s32 1, %s1042_s14 }
  0x45   : > { %s1239_s3 = scalar_select %p85_p10, %s1030_s11, %s1492_s25  }
  0x46   : > { %s1244_s24 = scalar_select %p38_p12, %s1042_s14, %s1493_s20  }
  0x47   : > { %s1246_s17 = scalar_lea.sflag [#allocation4], %s137_s30  ;;  %s906_s21 = scalar_lea.hbm %s1234_s28, 1024 }
  0x48   : > { %p907_p0 = scmp.ne.s32.totalorder %s1234_s28, %s906_s21  ;;  %p1494_p5 = scmp.ne.s32.totalorder %s1488_s5, 0 }
  0x49   : > { %s911_s4 = scalar_lea.hbm %s1464_s0, 4096  ;;  %p912_p11 = scmp.lt.u32.totalorder %s1234_s28, %s1464_s0 }
  0x4a   : > { %p908_p7 = pneg %p1494_p5  ;;  %p913_p13 = scmp.lt.u32.totalorder %s911_s4, %s906_s21 }
  0x4b   : > { %p915_p4 = scmp.lt.u32.totalorder %s906_s21, %s1234_s28 }
  0x4c   : > { %p909_p8 = pnand %p908_p7, %p907_p0  ;;  %p914_p1 = por %p913_p13, %p912_p11 }
  0x4e   : > { %p910_p9 = pneg %p909_p8  ;;  %p916_p2 = por %p915_p4, %p914_p1 }
  0x50   : > { %p917_p3 = pnand %p916_p2, %p910_p9 }
  0x52   : > { %920 = shalt.err (!%p917_p3)
}
  0x53   : > { %s921_s20 = scalar_lea.vmem %s1227_s7, 1024  ;;  %s1067_s30 = smov [#allocation3]  }
  0x54   : > { %p922_p6 = scmp.ne.s32.totalorder %s1227_s7, %s921_s20  ;;  %s926_s22 = sshll.u32 %s1067_s30, 4  ;;  %s927_s22 = int_to_ptr.vmem [resolvable:$false] %s926_s22 }
  0x55   : > { %s928_s25 = scalar_lea.vmem %s927_s22, 2048  ;;  %p929_p0 = scmp.lt.s32.totalorder %s1227_s7, %s927_s22 }
  0x56   : > { %p924_p10 = pnand %p922_p6, %p908_p7  ;;  %p930_p8 = scmp.lt.s32.totalorder %s928_s25, %s921_s20 }
  0x58   : > { %p925_p12 = pneg %p924_p10  ;;  %p931_p11 = por %p930_p8, %p929_p0 }
  0x5a   : > { %p932_p13 = pnand %p931_p11, %p925_p12 }
  0x5c   : > { %935 = shalt.err (!%p932_p13)
}
  0x5d   : > { %s1068_s21 = smov 64   ;;  %s1069_s1 = smov 4  }
  0x5e   : > { %s1495_s6 = smov 128   ;;  %p1496_p7 = scmp.ne.s32.totalorder %s1486_s29, 0 }
  0x5f   : > { %765 = dma.hbm_to_vmem [thread:$0]  (!%p1494_p5), %s1234_s28, 1024, %s1227_s7, %s1246_s17, %s1495_s6, %s1068_s21, %s1069_s1  }
  0x60   : > { %162 = sbr.rel (%p1496_p7) target bundleno = 417 (0x1a1), region = 28  ;;  %s164_s4 = sand.u32 (!%p1496_p7), 1, %s1038_s13  }
  0x61   : > { %s664_s8 = sshll.u32 (!%p1496_p7), %s164_s4, 6  ;;  %s165_s12 = scalar_lea.sflag (!%p1496_p7), [#allocation4], %s164_s4 }
  0x62   : > { %s1278_s20 = scalar_lea.vmem (!%p1496_p7), [#allocation3], %s664_s8  ;;  %p1497_p9 = scmp.ne.s32.totalorder (!%p1496_p7), %s1482_s26, 0 }
  0x67   : > { %1009 = dma.done.wait (%p1497_p9), %s165_s12, 1024  }
  0x68   : > { %1011 = vsyncadd (%p1497_p9), %s165_s12, 4294966272  ;;  %p1498_p1 = scmp.ne.s32.totalorder %s1480_s23, 0 }
  0x6a   : > { %1013 = dma.done.wait (%p1498_p1), [#allocation7], 4096  }
  0x6b   : > { %1015 = vsyncadd (%p1498_p1), [#allocation7], 4294963200  ;;  %s190_s17 = sand.u32 1, %s1026_s10   ;;  %p667_p5 = scmp.ne.s32.totalorder %s1046_s15, 0 }
  0x6c   : > { %s666_s28 = sshll.u32 %s190_s17, 7  ;;  %v1070_v0 = vmov (!%p667_p5), 0.0  }
  0x6d   : > { %s1291_s29 = scalar_lea.vmem [#allocation8], %s666_s28  ;;  %199 = sbr.rel (%p667_p5) target bundleno = 117 (0x75), region = 40  ;;  %200 = vst [vmem:[#allocation2] sm:$0xff] (!%p667_p5), %v1070_v0  ;;  %201 = vst [vmem:[#allocation2 + $0x8] sm:$0xff] (!%p667_p5), %v1070_v0 }
  0x6e   : > { %202 = vst [vmem:[#allocation2 + $0x10] sm:$0xff] (!%p667_p5), %v1070_v0  ;;  %203 = vst [vmem:[#allocation2 + $0x18] sm:$0xff] (!%p667_p5), %v1070_v0 }
  0x6f   : > { %204 = vst [vmem:[#allocation2 + $0x20] sm:$0xff] (!%p667_p5), %v1070_v0  ;;  %205 = vst [vmem:[#allocation2 + $0x28] sm:$0xff] (!%p667_p5), %v1070_v0 }
  0x70   : > { %206 = vst [vmem:[#allocation2 + $0x30] sm:$0xff] (!%p667_p5), %v1070_v0  ;;  %207 = vst [vmem:[#allocation2 + $0x38] sm:$0xff] (!%p667_p5), %v1070_v0 }
  0x71   : > { %208 = vst [vmem:[#allocation2 + $0x40] sm:$0xff] (!%p667_p5), %v1070_v0  ;;  %209 = vst [vmem:[#allocation2 + $0x48] sm:$0xff] (!%p667_p5), %v1070_v0 }
  0x72   : > { %210 = vst [vmem:[#allocation2 + $0x50] sm:$0xff] (!%p667_p5), %v1070_v0  ;;  %211 = vst [vmem:[#allocation2 + $0x58] sm:$0xff] (!%p667_p5), %v1070_v0 }
  0x73   : > { %212 = vst [vmem:[#allocation2 + $0x60] sm:$0xff] (!%p667_p5), %v1070_v0  ;;  %213 = vst [vmem:[#allocation2 + $0x68] sm:$0xff] (!%p667_p5), %v1070_v0 }
  0x74   : > { %214 = vst [vmem:[#allocation2 + $0x70] sm:$0xff] %v1070_v0  ;;  %215 = vst [vmem:[#allocation2 + $0x78] sm:$0xff] %v1070_v0 }
  0x75 PF: > { %s668_s23 = sshll.u32 %s1046_s15, 7  ;;  %v870_v1 = vld [vmem:[%s1278_s20] sm:$0xff]   ;;  %v872_v27 = vld [vmem:[%s1278_s20 + $0x8] sm:$0xff]   ;;  %v874_v29 = vld [vmem:[%s1278_s20 + $0x10] sm:$0xff]   ;;  %p677_p4 = scmp.ne.s32.totalorder %s1046_s15, 1 }
  0x76   : > { %v871_v2 = vld [vmem:[%s1278_s20 + $0x20] sm:$0xff]   ;;  %s1297_s26 = scalar_lea.vmem [#allocation6], %s668_s23  ;;  %718 = vmatprep.mubr.bf16.mxu0 %v870_v1  ;;  %v873_v28 = vld [vmem:[%s1278_s20 + $0x28] sm:$0xff]   ;;  %v875_v30 = vld [vmem:[%s1278_s20 + $0x30] sm:$0xff]   ;;  %s678_s5 = sshll.u32 (!%p677_p4), %s1050_s16, 7 }
  0x77   : > { %v218_v3 = vld [vmem:[%s1297_s26] sm:$0xff]  ;;  %v219_v4 = vld [vmem:[%s1297_s26 + $0x8] sm:$0xff]  ;;  %v220_v5 = vld [vmem:[%s1297_s26 + $0x10] sm:$0xff]  ;;  %726 = vmatprep.mubr.bf16.mxu1 %v871_v2  ;;  %s1323_s7 = scalar_lea.vmem (!%p677_p4), [#allocation6], %s678_s5 }
  0x78   : > { %v234_v6 = vpack.c.bf16 %v219_v4, %v218_v3  ;;  %v221_v7 = vld [vmem:[%s1297_s26 + $0x18] sm:$0xff]  ;;  %v222_v9 = vld [vmem:[%s1297_s26 + $0x20] sm:$0xff]  ;;  %v223_v10 = vld [vmem:[%s1297_s26 + $0x28] sm:$0xff] }
  0x79   : > { %v235_v8 = vpack.c.bf16 %v221_v7, %v220_v5  ;;  %v236_v11 = vpack.c.bf16 %v223_v10, %v222_v9  ;;  %v224_v12 = vld [vmem:[%s1297_s26 + $0x30] sm:$0xff]  ;;  %v225_v13 = vld [vmem:[%s1297_s26 + $0x38] sm:$0xff]  ;;  %v226_v15 = vld [vmem:[%s1297_s26 + $0x40] sm:$0xff] }
  0x7a   : > { %702 = vmatprep.subr.bf16.mxu0 %v234_v6  ;;  %734 = vmatprep.subr.bf16.mxu1 %v234_v6  ;;  %v237_v14 = vpack.c.bf16 %v225_v13, %v224_v12  ;;  %v227_v16 = vld [vmem:[%s1297_s26 + $0x48] sm:$0xff]  ;;  %v228_v18 = vld [vmem:[%s1297_s26 + $0x50] sm:$0xff]  ;;  %v229_v19 = vld [vmem:[%s1297_s26 + $0x58] sm:$0xff] }
  0x7b   : > { %703 = vmatpush3.bf16.msra.mxu0 %v234_v6  ;;  %742 = vmatpush3.bf16.msra.mxu1 %v234_v6  ;;  %v238_v17 = vpack.c.bf16 %v227_v16, %v226_v15  ;;  %v239_v20 = vpack.c.bf16 %v229_v19, %v228_v18  ;;  %v230_v21 = vld [vmem:[%s1297_s26 + $0x60] sm:$0xff]  ;;  %v231_v22 = vld [vmem:[%s1297_s26 + $0x68] sm:$0xff]  ;;  %v232_v24 = vld [vmem:[%s1297_s26 + $0x70] sm:$0xff] }
  0x7c   : > { %704 = vmatprep.subr.bf16.mxu0 %v235_v8  ;;  %735 = vmatprep.subr.bf16.mxu1 %v235_v8  ;;  %v240_v23 = vpack.c.bf16 %v231_v22, %v230_v21  ;;  %v233_v25 = vld [vmem:[%s1297_s26 + $0x78] sm:$0xff]  ;;  %v244_v33 = vld [vmem:[#allocation2 + $0x10] sm:$0xff]  ;;  %v242_v35 = vld [vmem:[#allocation2] sm:$0xff] }
  0x7d   : > { %v241_v26 = vpack.c.bf16 %v233_v25, %v232_v24  ;;  %v876_v31 = vld [vmem:[%s1278_s20 + $0x18] sm:$0xff]   ;;  %v252_v34 = vld [vmem:[#allocation2 + $0x50] sm:$0xff]  ;;  %v250_v36 = vld [vmem:[#allocation2 + $0x40] sm:$0xff] }
  0x7e   : > { %v877_v32 = vld [vmem:[%s1278_s20 + $0x38] sm:$0xff]   ;;  %v243_v45 = vld [vmem:[#allocation2 + $0x8] sm:$0xff]  ;;  %v248_v57 = vld [vmem:[#allocation2 + $0x30] sm:$0xff] }
  0x7f   : > { %705 = vmatpush3.bf16.msra.mxu0 %v235_v8  ;;  %743 = vmatpush3.bf16.msra.mxu1 %v235_v8  ;;  %v245_v39 = vld [vmem:[#allocation2 + $0x18] sm:$0xff]  ;;  %v251_v46 = vld [vmem:[#allocation2 + $0x48] sm:$0xff]  ;;  %v256_v58 = vld [vmem:[#allocation2 + $0x70] sm:$0xff] }
  0x80   : > { %706 = vmatprep.subr.bf16.mxu0 %v236_v11  ;;  %736 = vmatprep.subr.bf16.mxu1 %v236_v11  ;;  %v253_v40 = vld [vmem:[#allocation2 + $0x58] sm:$0xff]  ;;  %v246_v59 = vld [vmem:[#allocation2 + $0x20] sm:$0xff]  ;;  %v247_v5 = vld [vmem:[#allocation2 + $0x28] sm:$0xff] }
  0x81   : > { %v254_v60 = vld [vmem:[#allocation2 + $0x60] sm:$0xff]  ;;  %v249_v63 = vld [vmem:[#allocation2 + $0x38] sm:$0xff]  ;;  %v255_v6 = vld [vmem:[#allocation2 + $0x68] sm:$0xff] }
  0x82   : > { %v257_v0 = vld [vmem:[#allocation2 + $0x78] sm:$0xff]  ;;  %v457_v22 = vld [vmem:[%s1323_s7] sm:$0xff] (!%p677_p4)  ;;  %v458_v24 = vld [vmem:[%s1323_s7 + $0x8] sm:$0xff] (!%p677_p4) }
  0x83   : > { %707 = vmatpush3.bf16.msra.mxu0 %v236_v11  ;;  %744 = vmatpush3.bf16.msra.mxu1 %v236_v11  ;;  %v459_v25 = vld [vmem:[%s1323_s7 + $0x10] sm:$0xff] (!%p677_p4) }
  0x84   : > { %708 = vmatprep.subr.bf16.mxu0 %v237_v14  ;;  %737 = vmatprep.subr.bf16.mxu1 %v237_v14 }
  0x87   : > { %709 = vmatpush3.bf16.msra.mxu0 %v237_v14  ;;  %745 = vmatpush3.bf16.msra.mxu1 %v237_v14 }
  0x88   : > { %710 = vmatprep.subr.bf16.mxu0 %v238_v17  ;;  %738 = vmatprep.subr.bf16.mxu1 %v238_v17 }
  0x8b   : > { %711 = vmatpush3.bf16.msra.mxu0 %v238_v17  ;;  %746 = vmatpush3.bf16.msra.mxu1 %v238_v17  ;;  %v473_v17 = vlaneseq (!%p677_p4) }
  0x8c   : > { %712 = vmatprep.subr.bf16.mxu0 %v239_v20  ;;  %739 = vmatprep.subr.bf16.mxu1 %v239_v20 }
  0x8f   : > { %713 = vmatpush3.bf16.msra.mxu0 %v239_v20  ;;  %747 = vmatpush3.bf16.msra.mxu1 %v239_v20 }
  0x90   : > { %714 = vmatprep.subr.bf16.mxu0 %v240_v23  ;;  %740 = vmatprep.subr.bf16.mxu1 %v240_v23 }
  0x93   : > { %715 = vmatpush3.bf16.msra.mxu0 %v240_v23  ;;  %748 = vmatpush3.bf16.msra.mxu1 %v240_v23  ;;  %v1326_v23 = vand.u32 (!%p677_p4), 127, %v473_v17 }
  0x94   : > { %716 = vmatprep.subr.bf16.mxu0 %v241_v26  ;;  %741 = vmatprep.subr.bf16.mxu1 %v241_v26 }
  0x95   : > { %vm475_vm0 = vcmp.lt.s32.totalorder (!%p677_p4), %v1326_v23, 32 }
  0x97   : > { %717 = vmatpush3.bf16.msra.mxu0 %v241_v26  ;;  %749 = vmatpush3.bf16.msra.mxu1 %v241_v26  ;;  %v460_v26 = vld [vmem:[%s1323_s7 + $0x18] sm:$0xff] (!%p677_p4) }
  0x9a   : > { %719 = vmatmul.mubr.bf16.vlgmr.msra.gmra.mrb[0].mxu0 %v872_v27  ;;  %727 = vmatmul.mubr.bf16.vlgmr.msra.gmra.mrb[0].mxu1 %v873_v28  ;;  %v461_v27 = vld [vmem:[%s1323_s7 + $0x20] sm:$0xff] (!%p677_p4) }
  0x9b   : > { %722 = vmatprep.mubr.bf16.mxu0 %v874_v29  ;;  %730 = vmatprep.mubr.bf16.mxu1 %v875_v30  ;;  %v462_v29 = vld [vmem:[%s1323_s7 + $0x28] sm:$0xff] (!%p677_p4) }
  0xa2   : > { %723 = vmatmul.mubr.bf16.gmra.mrb[4].mxu0 %v876_v31  ;;  %731 = vmatmul.mubr.bf16.gmra.mrb[4].mxu1 %v877_v32  ;;  %v463_v31 = vld [vmem:[%s1323_s7 + $0x30] sm:$0xff] (!%p677_p4) }
 0x16d   : > { %v720_v37 = vpop.f32.mrb[0].mxu0  ;;  %v728_v38 = vpop.f32.mrb[0].mxu1 }
 0x16e   : > { %v421_v41 = vadd.f32 %v720_v37, %v244_v33  ;;  %v429_v42 = vadd.f32 %v728_v38, %v252_v34  ;;  %v356_v43 = vpop.f32.mrb[1].mxu0  ;;  %v388_v44 = vpop.f32.mrb[1].mxu1  ;;  %v464_v33 = vld [vmem:[%s1323_s7 + $0x38] sm:$0xff] (!%p677_p4)  ;;  %v476_v34 = vsel (!%p677_p4), %vm475_vm0, %v457_v22, 0.0  ;;  %v479_v37 = vsel (!%p677_p4), %vm475_vm0, %v460_v26, 0.0 }
 0x16f   : > { %v419_v47 = vadd.f32 %v356_v43, %v242_v35  ;;  %v427_v48 = vadd.f32 %v388_v44, %v250_v36  ;;  %v721_v49 = vpop.f32.mrb[2].mxu0  ;;  %v729_v50 = vpop.f32.mrb[2].mxu1  ;;  %v477_v35 = vsel (!%p677_p4), %vm475_vm0, %v458_v24, 0.0  ;;  %v478_v36 = vsel (!%p677_p4), %vm475_vm0, %v459_v25, 0.0 }
 0x170   : > { %437 = vst [vmem:[#allocation2 + $0x10] sm:$0xff] %v421_v41  ;;  %445 = vst [vmem:[#allocation2 + $0x50] sm:$0xff] %v429_v42  ;;  %v422_v51 = vadd.f32 %v721_v49, %v245_v39  ;;  %v430_v52 = vadd.f32 %v729_v50, %v253_v40  ;;  %v359_v53 = vpop.f32.mrb[3].mxu0  ;;  %v391_v54 = vpop.f32.mrb[3].mxu1  ;;  %v465_v39 = vld [vmem:[%s1323_s7 + $0x40] sm:$0xff] (!%p677_p4)  ;;  %v482_v49 = vsel (!%p677_p4), %vm475_vm0, %v463_v31, 0.0 }
 0x171   : > { %435 = vst [vmem:[#allocation2] sm:$0xff] %v419_v47  ;;  %443 = vst [vmem:[#allocation2 + $0x40] sm:$0xff] %v427_v48  ;;  %v420_v55 = vadd.f32 %v359_v53, %v243_v45  ;;  %v428_v56 = vadd.f32 %v391_v54, %v251_v46  ;;  %v466_v45 = vld [vmem:[%s1323_s7 + $0x48] sm:$0xff] (!%p677_p4)  ;;  %v480_v47 = vsel (!%p677_p4), %vm475_vm0, %v461_v27, 0.0  ;;  %v481_v48 = vsel (!%p677_p4), %vm475_vm0, %v462_v29, 0.0 }
 0x172   : > { %438 = vst [vmem:[#allocation2 + $0x18] sm:$0xff] %v422_v51  ;;  %446 = vst [vmem:[#allocation2 + $0x58] sm:$0xff] %v430_v52  ;;  %v483_v50 = vsel (!%p677_p4), %vm475_vm0, %v464_v33, 0.0  ;;  %v467_v51 = vld [vmem:[%s1323_s7 + $0x50] sm:$0xff] (!%p677_p4) }
 0x173   : > { %436 = vst [vmem:[#allocation2 + $0x8] sm:$0xff] %v420_v55  ;;  %444 = vst [vmem:[#allocation2 + $0x48] sm:$0xff] %v428_v56 }
 0x175   : > { %v724_v61 = vpop.f32.mrb[4].mxu0  ;;  %v732_v62 = vpop.f32.mrb[4].mxu1  ;;  %454 = sbr.rel (%p677_p4) target bundleno = 391 (0x187), region = 44 }
 0x176   : > { %v425_v1 = vadd.f32 %v724_v61, %v248_v57  ;;  %v433_v2 = vadd.f32 %v732_v62, %v256_v58  ;;  %v372_v3 = vpop.f32.mrb[5].mxu0  ;;  %v404_v4 = vpop.f32.mrb[5].mxu1  ;;  %v468_v57 = vld [vmem:[%s1323_s7 + $0x58] sm:$0xff] (!%p677_p4)  ;;  %v485_v61 = vsel (!%p677_p4), %vm475_vm0, %v466_v45, 0.0  ;;  %v486_v62 = vsel (!%p677_p4), %vm475_vm0, %v467_v51, 0.0 }
 0x177   : > { %v423_v7 = vadd.f32 %v372_v3, %v246_v59  ;;  %v431_v8 = vadd.f32 %v404_v4, %v254_v60  ;;  %v725_v9 = vpop.f32.mrb[6].mxu0  ;;  %v733_v10 = vpop.f32.mrb[6].mxu1  ;;  %v494_v20 = vld [vmem:[#allocation2 + $0x10] sm:$0xff] (!%p677_p4)  ;;  %v469_v59 = vld [vmem:[%s1323_s7 + $0x60] sm:$0xff] (!%p677_p4)  ;;  %v484_v60 = vsel (!%p677_p4), %vm475_vm0, %v465_v39, 0.0 }
 0x178   : > { %441 = vst [vmem:[#allocation2 + $0x30] sm:$0xff] %v425_v1  ;;  %449 = vst [vmem:[#allocation2 + $0x70] sm:$0xff] %v433_v2  ;;  %v426_v11 = vadd.f32 %v725_v9, %v249_v63  ;;  %v434_v12 = vadd.f32 %v733_v10, %v257_v0  ;;  %v375_v13 = vpop.f32.mrb[7].mxu0  ;;  %v407_v14 = vpop.f32.mrb[7].mxu1  ;;  %v492_v18 = vld [vmem:[#allocation2] sm:$0xff] (!%p677_p4)  ;;  %v510_v42 = vsub.f32 (!%p677_p4), %v494_v20, %v478_v36  ;;  %v502_v52 = vld [vmem:[#allocation2 + $0x50] sm:$0xff] (!%p677_p4) }
 0x179   : > { %439 = vst [vmem:[#allocation2 + $0x20] sm:$0xff] %v423_v7  ;;  %447 = vst [vmem:[#allocation2 + $0x60] sm:$0xff] %v431_v8  ;;  %v424_v15 = vadd.f32 %v375_v13, %v247_v5  ;;  %v432_v16 = vadd.f32 %v407_v14, %v255_v6  ;;  %v495_v21 = vld [vmem:[#allocation2 + $0x18] sm:$0xff] (!%p677_p4)  ;;  %v508_v40 = vsub.f32 (!%p677_p4), %v492_v18, %v476_v34  ;;  %v500_v44 = vld [vmem:[#allocation2 + $0x40] sm:$0xff] (!%p677_p4)  ;;  %v487_v63 = vsel (!%p677_p4), %vm475_vm0, %v468_v57, 0.0 }
 0x17a   : > { %442 = vst [vmem:[#allocation2 + $0x38] sm:$0xff] %v426_v11  ;;  %450 = vst [vmem:[#allocation2 + $0x78] sm:$0xff] %v434_v12  ;;  %v493_v19 = vld [vmem:[#allocation2 + $0x8] sm:$0xff] (!%p677_p4)  ;;  %v511_v43 = vsub.f32 (!%p677_p4), %v495_v21, %v479_v37  ;;  %v503_v58 = vld [vmem:[#allocation2 + $0x58] sm:$0xff] (!%p677_p4)  ;;  %v516_v2 = vsub.f32 (!%p677_p4), %v500_v44, %v484_v60  ;;  %v518_v4 = vsub.f32 (!%p677_p4), %v502_v52, %v486_v62  ;;  %v488_v9 = vsel (!%p677_p4), %vm475_vm0, %v469_v59, 0.0 }
 0x17b   : > { %440 = vst [vmem:[#allocation2 + $0x28] sm:$0xff] %v424_v15  ;;  %448 = vst [vmem:[#allocation2 + $0x68] sm:$0xff] %v432_v16  ;;  %v509_v41 = vsub.f32 (!%p677_p4), %v493_v19, %v477_v35  ;;  %v501_v46 = vld [vmem:[#allocation2 + $0x48] sm:$0xff] (!%p677_p4)  ;;  %v519_v5 = vsub.f32 (!%p677_p4), %v503_v58, %v487_v63  ;;  %v471_v7 = vld [vmem:[%s1323_s7 + $0x70] sm:$0xff] (!%p677_p4) }
 0x17c   : > { %524 = vst [vmem:[%s1291_s29] sm:$0xff] %v508_v40  ;;  %526 = vst [vmem:[%s1291_s29 + $0x10] sm:$0xff] %v510_v42  ;;  %v470_v1 = vld [vmem:[%s1323_s7 + $0x68] sm:$0xff]  ;;  %v517_v3 = vsub.f32 %v501_v46, %v485_v61  ;;  %v490_v11 = vsel %vm475_vm0, %v471_v7, 0.0  ;;  %v472_v12 = vld [vmem:[%s1323_s7 + $0x78] sm:$0xff] }
 0x17d   : > { %525 = vst [vmem:[%s1291_s29 + $0x8] sm:$0xff] %v509_v41  ;;  %527 = vst [vmem:[%s1291_s29 + $0x18] sm:$0xff] %v511_v43  ;;  %v489_v10 = vsel %vm475_vm0, %v470_v1, 0.0  ;;  %v491_v17 = vsel %vm475_vm0, %v472_v12, 0.0 }
 0x17e   : > { %532 = vst [vmem:[%s1291_s29 + $0x40] sm:$0xff] %v516_v2  ;;  %533 = vst [vmem:[%s1291_s29 + $0x48] sm:$0xff] %v517_v3 }
 0x17f   : > { %v498_v32 = vld [vmem:[#allocation2 + $0x30] sm:$0xff]  ;;  %534 = vst [vmem:[%s1291_s29 + $0x50] sm:$0xff] %v518_v4  ;;  %535 = vst [vmem:[%s1291_s29 + $0x58] sm:$0xff] %v519_v5 }
 0x180   : > { %v496_v28 = vld [vmem:[#allocation2 + $0x20] sm:$0xff]  ;;  %v514_v55 = vsub.f32 %v498_v32, %v482_v49  ;;  %v506_v8 = vld [vmem:[#allocation2 + $0x70] sm:$0xff] }
 0x181   : > { %v499_v38 = vld [vmem:[#allocation2 + $0x38] sm:$0xff]  ;;  %v512_v53 = vsub.f32 %v496_v28, %v480_v47  ;;  %v504_v0 = vld [vmem:[#allocation2 + $0x60] sm:$0xff]  ;;  %v522_v16 = vsub.f32 %v506_v8, %v490_v11 }
 0x182   : > { %v497_v30 = vld [vmem:[#allocation2 + $0x28] sm:$0xff]  ;;  %v515_v56 = vsub.f32 %v499_v38, %v483_v50  ;;  %530 = vst [vmem:[%s1291_s29 + $0x30] sm:$0xff] %v514_v55  ;;  %v507_v13 = vld [vmem:[#allocation2 + $0x78] sm:$0xff]  ;;  %v520_v14 = vsub.f32 %v504_v0, %v488_v9 }
 0x183   : > { %v513_v54 = vsub.f32 %v497_v30, %v481_v48  ;;  %528 = vst [vmem:[%s1291_s29 + $0x20] sm:$0xff] %v512_v53  ;;  %v505_v6 = vld [vmem:[#allocation2 + $0x68] sm:$0xff]  ;;  %v523_v18 = vsub.f32 %v507_v13, %v491_v17  ;;  %538 = vst [vmem:[%s1291_s29 + $0x70] sm:$0xff] %v522_v16 }
 0x184   : > { %531 = vst [vmem:[%s1291_s29 + $0x38] sm:$0xff] %v515_v56  ;;  %v521_v15 = vsub.f32 %v505_v6, %v489_v10  ;;  %536 = vst [vmem:[%s1291_s29 + $0x60] sm:$0xff] %v520_v14 }
 0x185   : > { %529 = vst [vmem:[%s1291_s29 + $0x28] sm:$0xff] %v513_v54  ;;  %539 = vst [vmem:[%s1291_s29 + $0x78] sm:$0xff] %v523_v18 }
 0x186   : > { %537 = vst [vmem:[%s1291_s29 + $0x68] sm:$0xff] %v521_v15 }
 0x187 PF: > { %s685_s15 = sshll.u32 %s1050_s16, 11  ;;  %s554_s21 = sshll.u32 %s1291_s29, 4  ;;  %s1399_s21 = int_to_ptr.vmem [resolvable:$true] %s554_s21 }
 0x188   : > { %s1396_s25 = scalar_lea.hbm %s1466_s2, %s685_s15  ;;  %s1403_s1 = scalar_lea.sflag [#allocation5], %s190_s17 }
 0x189   : > { %s936_s6 = scalar_lea.vmem %s1399_s21, 2048  ;;  %p1499_p3 = scmp.ne.s32.totalorder %s1483_s27, 0 }
 0x18a   : > { %p937_p2 = scmp.ne.s32.totalorder %s1399_s21, %s936_s6  ;;  %s1071_s16 = smov [#allocation8]  }
 0x18b   : > { %s940_s4 = sshll.u32 %s1071_s16, 4  ;;  %s941_s4 = int_to_ptr.vmem [resolvable:$false] %s940_s4 }
 0x18c   : > { %p938_p6 = pnand %p937_p2, %p1499_p3  ;;  %s942_s8 = scalar_lea.vmem %s941_s4, 4096 }
 0x18d   : > { %p943_p12 = scmp.lt.s32.totalorder %s1399_s21, %s941_s4  ;;  %p944_p0 = scmp.lt.s32.totalorder %s942_s8, %s936_s6 }
 0x18e   : > { %p939_p10 = pneg %p938_p6 }
 0x18f   : > { %p945_p8 = por %p944_p0, %p943_p12 }
 0x191   : > { %p946_p11 = pnand %p945_p8, %p939_p10 }
 0x193   : > { %949 = shalt.err (!%p946_p11)
}
 0x194   : > { %s950_s12 = scalar_lea.hbm %s1396_s25, 2048  ;;  %s954_s28 = scalar_lea.hbm %s1466_s2, 4096 }
 0x195   : > { %p951_p13 = scmp.ne.s32.totalorder %s1396_s25, %s950_s12  ;;  %p955_p1 = scmp.lt.u32.totalorder %s1396_s25, %s1466_s2 }
 0x196   : > { %p956_p5 = scmp.lt.u32.totalorder %s954_s28, %s950_s12  ;;  %p958_p2 = scmp.lt.u32.totalorder %s950_s12, %s1396_s25 }
 0x197   : > { %p952_p7 = pnand %p951_p13, %p1499_p3 }
 0x198   : > { %p957_p4 = por %p956_p5, %p955_p1 }
 0x199   : > { %p953_p9 = pneg %p952_p7 }
 0x19a   : > { %p959_p6 = por %p958_p2, %p957_p4 }
 0x19c   : > { %p960_p10 = pnand %p959_p6, %p953_p9 }
 0x19e   : > { %963 = shalt.err (!%p960_p10)
}
 0x19f   : > { %s1072_s26 = smov 128   ;;  %s1073_s5 = smov 8  }
 0x1a0   : > { %756 = dma.vmem_to_hbm [thread:$0]  (%p1499_p3), %s1399_s21, 2048, %s1396_s25, %s1403_s1, %s1072_s26, %s1072_s26, %s1073_s5  }
 0x1a1 PF: > { %s1500_s7 = sld [smem:[#allocation13_spill]]  ;;  %p773_p12 = scmp.ge.s32.totalorder %s1062_s19, 2 }
 0x1a2   : > { %s569_s15 = sand.u32 1, %s1022_s9  }
 0x1a3   : > { %s570_s30 = scalar_lea.sflag [#allocation5], %s569_s15 }
 0x1a7   : > { %p1501_p0 = scmp.ne.s32.totalorder %s1500_s7, 0 }
 0x1a9   : > { %p767_p8 = pnand %p773_p12, %p1501_p0 }
 0x1ab   : > { %1017 = dma.done.wait (!%p767_p8), %s570_s30, 2048  }
 0x1ac   : > { %1019 = vsyncadd (!%p767_p8), %s570_s30, 4294965248  ;;  %s19_s19 = sadd.s32 1, %s1062_s19   ;;  %s1502_s15 = sld [smem:[#allocation12_spill]] }
 0x1ad   : > { %p16_p11 = scmp.ge.s32.totalorder %s19_s19, 6   ;;  %s1503_s17 = sld [smem:[#allocation14_spill]] }
 0x1ae   : > { %s1504_s27 = sld [smem:[#allocation15_spill]]  ;;  %s1505_s9 = smov %s1026_s10 }
 0x1af   : > { %s1506_s10 = smov %s1030_s11  ;;  %s1507_s11 = smov %s1239_s3 }
 0x1b0   : > { %s1508_s12 = smov %s1038_s13  ;;  %s1509_s13 = smov %s1042_s14 }
 0x1b1   : > { %s1510_s14 = smov %s1244_s24  ;;  %s1511_s16 = smov %s1058_s18 }
 0x1b2   :  { %18 = sbr.rel (!%p16_p11) target bundleno = 12 (0xc), region = 87 }
 0x1b4   : > { %s1512_s18 = smov %s1504_s27 }
 0x1b9   :  { %575 = vsyncpa [#allocation4], 1 }
 0x1ba   :  { %577 = vsyncpa [#allocation4 + $0x1], 1 }
 0x1bb   :  { %578 = vsyncpa [#allocation7], 1 }
 0x1bc   :  { %579 = vsyncpa [#allocation5], 1 }
 0x1bd   :  { %581 = vsyncpa [#allocation5 + $0x1], 1 }

</bundles_post_ra>
